<compile_context>
chip_gen: v5e
topology: v5e:2x2
jax: 0.10.0
libtpu: 0.0.40
codegen_flags: <defaults>
</compile_context>

<pallas_src>
import functools

import jax
import jax.numpy as jnp
from jax.experimental import pallas as pl
from jax.experimental.pallas import tpu as pltpu

LANES = 128


def _cdiv(a, b):
    return (a + b - 1) // b


def _default_num_cores():
    # Best-effort: 2 TensorCores per chip on v7x-class parts, 1 on v2-v6.
    try:
        kind = jax.devices()[0].device_kind.lower()
    except Exception:
        return 1
    return 2 if "v7" in kind else 1


def _vfl_kernel(pred_ref, gt_ref, lbl_ref, out_ref, *,
                alpha, gamma, tile_m, steps, n_valid, has_tail):
    pi = pl.program_id(0)   # parallel (core) axis
    i = pl.program_id(1)    # arbitrary (reduction) axis

    @pl.when(i == 0)
    def _():
        out_ref[...] = jnp.zeros_like(out_ref)

    # PyTorch computes the BCE part with autocast disabled -> float32.
    p = pred_ref[...].astype(jnp.float32)
    g = gt_ref[...].astype(jnp.float32)
    lbl = lbl_ref[...].astype(jnp.float32)

    # One shared transcendental: e = exp(-|p|).
    e = jnp.exp(-jnp.abs(p))
    # Exact sigmoid from e (exact divide keeps parity with the reference):
    #   p >= 0 : 1 / (1 + exp(-p));   p < 0 : exp(p) / (1 + exp(p))
    sig = jnp.where(p >= 0.0, 1.0, e) / (1.0 + e)

    # Small-integer gamma -> unrolled VPU multiplies instead of pow (2x EUP).
    if float(gamma) == float(int(gamma)) and 1 <= int(gamma) <= 4:
        sig_pow = sig
        for _ in range(int(gamma) - 1):
            sig_pow = sig_pow * sig
    else:
        sig_pow = sig ** gamma

    weight = alpha * sig_pow * (1.0 - lbl) + g * lbl

    # Numerically stable binary_cross_entropy_with_logits (reduction='none'),
    # reusing e for the log1p term.
    bce = jnp.maximum(p, 0.0) - p * g + jnp.log1p(e)
    contrib = bce * weight

    def accumulate(c):
        # Tree-reduce tile_m rows -> 8 rows with vreg-wise VPU adds (layout
        # preserving reshape), then accumulate into the small resident block.
        out_ref[...] += c.reshape(tile_m // 8, 8, LANES).sum(axis=0)

    if not has_tail:
        accumulate(contrib)
    else:
        base_row = (pi * steps + i) * tile_m
        block_end = (base_row + tile_m) * LANES

        # Interior blocks: no per-element mask work at all.
        @pl.when(block_end <= n_valid)
        def _():
            accumulate(contrib)

        # Only the block(s) containing the ragged tail pay for the mask
        # (also zeroes garbage rows of partial / clamped boundary blocks).
        @pl.when(block_end > n_valid)
        def _():
            row = jax.lax.broadcasted_iota(jnp.int32, contrib.shape, 0)
            lane = jax.lax.broadcasted_iota(jnp.int32, contrib.shape, 1)
            flat_idx = (base_row + row) * LANES + lane
            accumulate(jnp.where(flat_idx < n_valid, contrib, 0.0))


def varifocal_loss(pred_score, gt_score, label, alpha=0.75, gamma=2.0, *,
                   num_cores=None, max_tile_m=2048):
    """Varifocal loss (sum reduction). Inputs: same shape, any rank / dtype."""
    assert pred_score.shape == gt_score.shape == label.shape
    n = int(pred_score.size)
    if n == 0:
        return jnp.zeros((), jnp.float32)
    assert n < 2 ** 31, "int32 flat-index mask would overflow"

    if num_cores is None:
        num_cores = _default_num_cores()

    pred_f = pred_score.reshape(-1)
    gt_f = gt_score.reshape(-1)
    lbl_f = label.reshape(-1)

    # Sublane alignment depends on the narrowest input dtype
    # (f32: 8 rows / vreg, bf16: 16, int8/bool: 32).
    min_item = min(jnp.dtype(x.dtype).itemsize for x in (pred_f, gt_f, lbl_f))
    row_align = {1: 32, 2: 16}.get(int(min_item), 8)

    # Lane-dense view: (rows, 128). Pad only up to the next multiple of
    # 128*row_align (a few KiB at most) when the flat size is unaligned or
    # tiny; everything else is handled by partial boundary blocks + the
    # in-kernel mask, so no full-coverage pad copies are materialized.
    rows = max(_cdiv(n, LANES), row_align)
    n_padded = rows * LANES
    if n_padded != n:
        pad = n_padded - n
        pred_f = jnp.pad(pred_f, (0, pad))
        gt_f = jnp.pad(gt_f, (0, pad))
        lbl_f = jnp.pad(lbl_f, (0, pad))

    pred2d = pred_f.reshape(rows, LANES)
    gt2d = gt_f.reshape(rows, LANES)
    lbl2d = lbl_f.reshape(rows, LANES)

    # Core split only helps on multi-TC chips; cap by available aligned rows.
    num_cores = max(1, min(int(num_cores), rows // row_align))

    # Tile height: as big as possible (<= max_tile_m), aligned, never larger
    # than the array's row count (so a block never exceeds the array extent).
    max_tile_m = max(row_align, (int(max_tile_m) // row_align) * row_align)
    rows_per_core = _cdiv(rows, num_cores)
    tile_m = max(row_align, min(max_tile_m,
                                (rows_per_core // row_align) * row_align))

    steps = _cdiv(rows, num_cores * tile_m)
    coverage_rows = num_cores * steps * tile_m
    assert coverage_rows * LANES < 2 ** 31
    has_tail = coverage_rows * LANES != n

    # Clamp the input block index so logical grid steps that would fall fully
    # past the array re-read the last (partial) block instead; their
    # contribution is zeroed by the tail mask.
    last_block = _cdiv(rows, tile_m) - 1
    if num_cores * steps - 1 > last_block:
        def in_index_map(pi, i):
            return (jnp.minimum(pi * steps + i, last_block), 0)
    else:
        def in_index_map(pi, i):
            return (pi * steps + i, 0)

    in_spec = pl.BlockSpec((tile_m, LANES), in_index_map)
    # Per-core resident (8, 128) partial-sum block; first dim squeezed.
    out_spec = pl.BlockSpec((None, 8, LANES), lambda pi, i: (pi, 0, 0))

    kernel = functools.partial(
        _vfl_kernel, alpha=float(alpha), gamma=float(gamma),
        tile_m=tile_m, steps=steps, n_valid=n, has_tail=has_tail)

    bytes_accessed = sum(int(x.size) * x.dtype.itemsize
                         for x in (pred2d, gt2d, lbl2d))
    bytes_accessed += num_cores * 8 * LANES * 4
    cost = pl.CostEstimate(flops=22 * n, transcendentals=2 * n,
                           bytes_accessed=bytes_accessed)

    partials = pl.pallas_call(
        kernel,
        out_shape=jax.ShapeDtypeStruct((num_cores, 8, LANES), jnp.float32),
        grid_spec=pltpu.PrefetchScalarGridSpec(
            num_scalar_prefetch=0,
            grid=(num_cores, steps),            # reduction axis last
            in_specs=[in_spec, in_spec, in_spec],
            out_specs=out_spec,
        ),
        compiler_params=pltpu.CompilerParams(
            dimension_semantics=("parallel", "arbitrary"),
            vmem_limit_bytes=32 * 1024 * 1024,
        ),
        cost_estimate=cost,
    )(pred2d, gt2d, lbl2d)

    # Single tiny cross-lane reduction outside the kernel.
    return jnp.sum(partials)


def _reference(pred, gt, lbl, alpha=0.75, gamma=2.0):
    p = pred.astype(jnp.float32)
    g = gt.astype(jnp.float32)
    l = lbl.astype(jnp.float32)
    w = alpha * jax.nn.sigmoid(p) ** gamma * (1.0 - l) + g * l
    bce = jnp.maximum(p, 0.0) - p * g + jnp.log1p(jnp.exp(-jnp.abs(p)))
    return jnp.sum(bce * w)


if __name__ == "__main__":
    key = jax.random.PRNGKey(0)
    k1, k2, k3 = jax.random.split(key, 3)

    # batch, anchors, classes (lane-aligned: 2*64*16 = 16 rows of 128).
    B, A, C = 2, 64, 16
    pred_score = jax.random.normal(k1, (B, A, C), dtype=jnp.float32) * 2.0
    gt_score = jax.random.uniform(k2, (B, A, C), dtype=jnp.float32)
    label = (jax.random.uniform(k3, (B, A, C)) > 0.8).astype(jnp.float32)

    loss = jax.block_until_ready(varifocal_loss(pred_score, gt_score, label))
    ref = _reference(pred_score, gt_score, label)
    assert jnp.allclose(loss, ref, rtol=1e-5, atol=1e-4), (loss, ref)

    # Non-128-aligned shape: minimal pad + tail mask in the final block only.
    p2 = jax.random.normal(k2, (3, 7, 5), dtype=jnp.float32)
    g2 = jax.random.uniform(k3, (3, 7, 5), dtype=jnp.float32)
    l2 = (jax.random.uniform(k1, (3, 7, 5)) > 0.7).astype(jnp.float32)
    loss2 = jax.block_until_ready(varifocal_loss(p2, g2, l2))
    ref2 = _reference(p2, g2, l2)
    assert jnp.allclose(loss2, ref2, rtol=1e-5, atol=1e-4), (loss2, ref2)

    # Multi-step reduction, explicit 2-way core split, partial boundary block
    # and a clamped (fully out-of-range) logical grid step.
    p3 = jax.random.normal(k1, (17, 128), dtype=jnp.float32)
    g3 = jax.random.uniform(k2, (17, 128), dtype=jnp.float32)
    l3 = (jax.random.uniform(k3, (17, 128)) > 0.8).astype(jnp.float32)
    loss3 = jax.block_until_ready(
        varifocal_loss(p3, g3, l3, num_cores=2, max_tile_m=8))
    ref3 = _reference(p3, g3, l3)
    assert jnp.allclose(loss3, ref3, rtol=1e-5, atol=1e-4), (loss3, ref3)

    # Lower-precision inputs (pure bandwidth win): bf16 pred/gt, f32 label.
    p4 = (jax.random.normal(k3, (B, A, C)) * 2.0).astype(jnp.bfloat16)
    g4 = jax.random.uniform(k1, (B, A, C)).astype(jnp.bfloat16)
    l4 = (jax.random.uniform(k2, (B, A, C)) > 0.8).astype(jnp.float32)
    loss4 = jax.block_until_ready(varifocal_loss(p4, g4, l4))
    ref4 = _reference(p4, g4, l4)
    assert jnp.allclose(loss4, ref4, rtol=1e-4, atol=1e-3), (loss4, ref4)

    print("KERNEL_OK")
</pallas_src>

<mosaic_0001>
module attributes {stable_mosaic.version = 11 : i64} {
  func.func @_vfl_kernel(%arg0: i32, %arg1: i32, %arg2: memref<16x128xf32, #tpu.memory_space<vmem>>, %arg3: memref<16x128xf32, #tpu.memory_space<vmem>>, %arg4: memref<16x128xf32, #tpu.memory_space<vmem>>, %arg5: memref<1x8x128xf32, #tpu.memory_space<vmem>>) attributes {dimension_semantics = [#tpu.dimension_semantics<parallel>, #tpu.dimension_semantics<arbitrary>], iteration_bounds = array<i64: 1, 1>, scalar_prefetch = 0 : i64, scratch_operands = 0 : i64, tpu.core_type = #tpu.core_type<tc>, window_params = [{transform_indices = @transform_0, window_bounds = array<i64: 16, 128>}, {transform_indices = @transform_1, window_bounds = array<i64: 16, 128>}, {transform_indices = @transform_2, window_bounds = array<i64: 16, 128>}, {transform_indices = @transform_3, window_bounds = array<i64: 1, 8, 128>}]} {
    %c0_i32 = arith.constant 0 : i32
    %0 = arith.cmpi eq, %arg1, %c0_i32 : i32
    %1 = arith.extui %0 : i1 to i32
    %c0_i32_0 = arith.constant 0 : i32
    %2 = arith.cmpi ne, %1, %c0_i32_0 : i32
    scf.if %2 {
      %cst_19 = arith.constant 0.000000e+00 : f32
      %40 = vector.broadcast %cst_19 : f32 to vector<8x128xf32>
      %c0_20 = arith.constant 0 : index
      %c0_21 = arith.constant 0 : index
      %c0_22 = arith.constant 0 : index
      %41 = vector.load %arg5[%c0_20, %c0_21, %c0_22] : memref<1x8x128xf32, #tpu.memory_space<vmem>>, vector<1x8x128xf32>
      %42 = vector.shape_cast %41 : vector<1x8x128xf32> to vector<8x128xf32>
      %43 = vector.shape_cast %40 : vector<8x128xf32> to vector<1x8x128xf32>
      tpu.vector_store %arg5[%c0_20, %c0_21, %c0_22], %43 {strides = array<i32>} : memref<1x8x128xf32, #tpu.memory_space<vmem>>, vector<1x8x128xf32>,
    } else {
    }
    %c0 = arith.constant 0 : index
    %c0_1 = arith.constant 0 : index
    %3 = vector.load %arg2[%c0, %c0_1] : memref<16x128xf32, #tpu.memory_space<vmem>>, vector<16x128xf32>
    %c0_2 = arith.constant 0 : index
    %c0_3 = arith.constant 0 : index
    %4 = vector.load %arg3[%c0_2, %c0_3] : memref<16x128xf32, #tpu.memory_space<vmem>>, vector<16x128xf32>
    %c0_4 = arith.constant 0 : index
    %c0_5 = arith.constant 0 : index
    %5 = vector.load %arg4[%c0_4, %c0_5] : memref<16x128xf32, #tpu.memory_space<vmem>>, vector<16x128xf32>
    %6 = math.absf %3 : vector<16x128xf32>
    %cst = arith.constant 0.000000e+00 : f32
    %7 = vector.broadcast %cst : f32 to vector<16x128xf32>
    %8 = arith.subf %7, %6 : vector<16x128xf32>
    %9 = math.exp %8 : vector<16x128xf32>
    %cst_6 = arith.constant 0.000000e+00 : f32
    %10 = vector.broadcast %cst_6 : f32 to vector<16x128xf32>
    %11 = arith.cmpf oge, %3, %10 : vector<16x128xf32>
    %cst_7 = arith.constant 1.000000e+00 : f32
    %12 = vector.broadcast %cst_7 : f32 to vector<16x128xf32>
    %13 = arith.select %11, %12, %9 : vector<16x128xi1>, vector<16x128xf32>
    %cst_8 = arith.constant 1.000000e+00 : f32
    %14 = vector.broadcast %cst_8 : f32 to vector<16x128xf32>
    %15 = arith.addf %14, %9 : vector<16x128xf32>
    %16 = arith.divf %13, %15 : vector<16x128xf32>
    %17 = arith.mulf %16, %16 : vector<16x128xf32>
    %cst_9 = arith.constant 7.500000e-01 : f32
    %18 = vector.broadcast %cst_9 : f32 to vector<16x128xf32>
    %19 = arith.mulf %18, %17 : vector<16x128xf32>
    %cst_10 = arith.constant 1.000000e+00 : f32
    %20 = vector.broadcast %cst_10 : f32 to vector<16x128xf32>
    %21 = arith.subf %20, %5 : vector<16x128xf32>
    %22 = arith.mulf %19, %21 : vector<16x128xf32>
    %23 = arith.mulf %4, %5 : vector<16x128xf32>
    %24 = arith.addf %22, %23 : vector<16x128xf32>
    %cst_11 = arith.constant 0.000000e+00 : f32
    %25 = vector.broadcast %cst_11 : f32 to vector<16x128xf32>
    %26 = arith.maximumf %3, %25 : vector<16x128xf32>
    %27 = arith.mulf %3, %4 : vector<16x128xf32>
    %28 = arith.subf %26, %27 : vector<16x128xf32>
    %29 = math.log1p %9 : vector<16x128xf32>
    %30 = arith.addf %28, %29 : vector<16x128xf32>
    %31 = arith.mulf %30, %24 : vector<16x128xf32>
    %c0_12 = arith.constant 0 : index
    %c0_13 = arith.constant 0 : index
    %c0_14 = arith.constant 0 : index
    %32 = vector.load %arg5[%c0_12, %c0_13, %c0_14] : memref<1x8x128xf32, #tpu.memory_space<vmem>>, vector<1x8x128xf32>
    %33 = vector.shape_cast %32 : vector<1x8x128xf32> to vector<8x128xf32>
    %34 = vector.shape_cast %31 : vector<16x128xf32> to vector<2x8x128xf32>
    %cst_15 = arith.constant dense<0.000000e+00> : vector<8x128xf32>
    %35 = vector.multi_reduction <add>, %34, %cst_15 [0] : vector<2x8x128xf32> to vector<8x128xf32>
    %36 = arith.addf %33, %35 : vector<8x128xf32>
    %c0_16 = arith.constant 0 : index
    %c0_17 = arith.constant 0 : index
    %c0_18 = arith.constant 0 : index
    %37 = vector.load %arg5[%c0_16, %c0_17, %c0_18] : memref<1x8x128xf32, #tpu.memory_space<vmem>>, vector<1x8x128xf32>
    %38 = vector.shape_cast %37 : vector<1x8x128xf32> to vector<8x128xf32>
    %39 = vector.shape_cast %36 : vector<8x128xf32> to vector<1x8x128xf32>
    tpu.vector_store %arg5[%c0_16, %c0_17, %c0_18], %39 {strides = array<i32>} : memref<1x8x128xf32, #tpu.memory_space<vmem>>, vector<1x8x128xf32>,
    return
  }
  func.func @transform_0(%arg0: i32, %arg1: i32) -> (i32, i32) {
    %c1_i32 = arith.constant 1 : i32
    %0 = arith.muli %arg0, %c1_i32 : i32
    %1 = arith.addi %0, %arg1 : i32
    %c0_i32 = arith.constant 0 : i32
    %c0_i32_0 = arith.constant 0 : i32
    return %1, %c0_i32 : i32, i32
  }
  func.func @transform_1(%arg0: i32, %arg1: i32) -> (i32, i32) {
    %c1_i32 = arith.constant 1 : i32
    %0 = arith.muli %arg0, %c1_i32 : i32
    %1 = arith.addi %0, %arg1 : i32
    %c0_i32 = arith.constant 0 : i32
    %c0_i32_0 = arith.constant 0 : i32
    return %1, %c0_i32 : i32, i32
  }
  func.func @transform_2(%arg0: i32, %arg1: i32) -> (i32, i32) {
    %c1_i32 = arith.constant 1 : i32
    %0 = arith.muli %arg0, %c1_i32 : i32
    %1 = arith.addi %0, %arg1 : i32
    %c0_i32 = arith.constant 0 : i32
    %c0_i32_0 = arith.constant 0 : i32
    return %1, %c0_i32 : i32, i32
  }
  func.func @transform_3(%arg0: i32, %arg1: i32) -> (i32, i32, i32) {
    %c0_i32 = arith.constant 0 : i32
    %c0_i32_0 = arith.constant 0 : i32
    %c0_i32_1 = arith.constant 0 : i32
    return %arg0, %c0_i32, %c0_i32_0 : i32, i32, i32
  }
}

</mosaic_0001>

<bundles_post_ra>
// kernel: tpu_custom_call.1
= control target key start
LH: loop header
LB: loop body
LE: loop exit
PB: predicated region body
PF: predicated region fallthrough
CT: control target
= control target key end

     0   :  { %8 = vsyncpa [#allocation3], 0  ;;  %s399_s0 = inlined_call_operand.hbm [shape: f32[16,128], index: 0, kind: input, shape index: {}]   ;;  %s400_s1 = inlined_call_operand.hbm [shape: f32[16,128], index: 1, kind: input, shape index: {}]   ;;  %s401_s2 = inlined_call_operand.hbm [shape: f32[16,128], index: 2, kind: input, shape index: {}]   ;;  %s402_s3 = inlined_call_operand.hbm [shape: f32[1,8,128], index: 3, kind: output, shape index: {}]  }
   0x1   :  { %9 = vsyncpa [#allocation6], 0 }
   0x2   :  { %10 = vsyncpa [#allocation4], 0  ;;  %s36_s14 = sshll.u32 %s400_s1, 4  ;;  %s318_s15 = smov [#allocation5]   ;;  %s37_s14 = int_to_ptr.hbm [resolvable:$true] %s36_s14 }
   0x3   :  { %s38_s16 = sshll.u32 %s318_s15, 4  ;;  %s19_s19 = sshll.u32 %s399_s0, 4  ;;  %s39_s16 = int_to_ptr.vmem [resolvable:$true] %s38_s16  ;;  %s20_s19 = int_to_ptr.hbm [resolvable:$true] %s19_s19 }
   0x4   :  { %s319_s20 = smov 128   ;;  %s320_s21 = smov 8  }
   0x5   :  { %44 = dma.hbm_to_vmem [thread:$0]  %s37_s14, 256, %s39_s16, [#allocation6], %s319_s20, %s319_s20, %s320_s21  }
   0x6   :  { %s321_s22 = smov [#allocation2]   ;;  %s53_s26 = sshll.u32 %s401_s2, 4  ;;  %s54_s26 = int_to_ptr.hbm [resolvable:$true] %s53_s26 }
   0x7   :  { %s21_s23 = sshll.u32 %s321_s22, 4  ;;  %s322_s1 = smov [#allocation7]   ;;  %s22_s23 = int_to_ptr.vmem [resolvable:$true] %s21_s23 }
   0x8   :  { %27 = dma.hbm_to_vmem [thread:$0]  %s20_s19, 256, %s22_s23, [#allocation3], %s319_s20, %s319_s20, %s320_s21  }
   0x9   :  { %s55_s27 = sshll.u32 %s322_s1, 4  ;;  %s56_s27 = int_to_ptr.vmem [resolvable:$true] %s55_s27 }
   0xa   :  { %61 = dma.hbm_to_vmem [thread:$0]  %s54_s26, 256, %s56_s27, [#allocation6], %s319_s20, %s319_s20, %s320_s21  }
   0xb   :  { %312 = dma.done.wait [#allocation3], 256  }
   0xc   :  { %313 = vsyncadd [#allocation3], 4294967040 }
   0xd   :  { %314 = dma.done.wait [#allocation6], 512  }
   0xe   :  { %315 = vsyncadd [#allocation6], 4294966784  ;;  %v353_v0 = vld [vmem:[#allocation2] sm:$0xff]  ;;  %v355_v1 = vld [vmem:[#allocation2 + $0x8] sm:$0xff]  ;;  %s323_s0 = smov [#allocation8]   ;;  %s186_s30 = sshll.u32 %s402_s3, 4  ;;  %s187_s30 = int_to_ptr.hbm [resolvable:$true] %s186_s30 }
   0xf   :  { %v91_v2 = vand.u32 2147483647, %v353_v0  ;;  %v92_v3 = vand.u32 2147483647, %v355_v1  ;;  %vm99_vm0 = vcmp.ge.f32.partialorder %v353_v0, 0.0  ;;  %vm100_vm1 = vcmp.ge.f32.partialorder %v355_v1, 0.0 }
  0x10   :  { %v87_v19 = vld [vmem:[#allocation5] sm:$0xff]  ;;  %v147_v26 = vmax.f32 %v353_v0, 0.0  ;;  %v148_v27 = vmax.f32 %v355_v1, 0.0  ;;  %v88_v29 = vld [vmem:[#allocation5 + $0x8] sm:$0xff]  ;;  %v89_v48 = vld [vmem:[#allocation7] sm:$0xff]  ;;  %s184_s2 = sshll.u32 %s323_s0, 4  ;;  %s185_s2 = int_to_ptr.vmem [resolvable:$true] %s184_s2 }
  0x11   :  { %v93_v4 = vsub.f32 0.0, %v91_v2  ;;  %v94_v5 = vsub.f32 0.0, %v92_v3  ;;  %v149_v33 = vmul.f32 %v87_v19, %v353_v0  ;;  %v150_v46 = vmul.f32 %v88_v29, %v355_v1  ;;  %v90_v53 = vld [vmem:[#allocation7 + $0x8] sm:$0xff] }
  0x12   :  { %v139_v61 = vsub.f32 1.0, %v89_v48  ;;  %v140_v0 = vsub.f32 1.0, %v90_v53 }
  0x13   :  { %v95_v6 = vmul.f32 1.442695, %v93_v4  ;;  %v97_v7 = vmul.f32 1.442695, %v94_v5  ;;  %v151_v62 = vsub.f32 %v147_v26, %v149_v33  ;;  %v152_v1 = vsub.f32 %v148_v27, %v150_v46 }
  0x14   :  { %v143_v4 = vmul.f32 %v89_v48, %v87_v19 }
  0x15   :  { %204 = vpow2.f32 %v95_v6 }
  0x16   :  { %206 = vpow2.f32 %v97_v7  ;;  %v144_v7 = vmul.f32 %v90_v53, %v88_v29 }
  0x1b   :  { %v205_v8 = vpop.eup %204 }
  0x1c   :  { %v207_v9 = vpop.eup %206  ;;  %v103_v10 = vadd.f32 1.0, %v205_v8  ;;  %v156_v15 = vmul.f32 -0.5, %v205_v8  ;;  %v159_v28 = vand.u32 2147483647, %v205_v8  ;;  %v101_v41 = vsel %vm99_vm0, 1.0, %v205_v8 }
  0x1d   :  { %v104_v11 = vadd.f32 1.0, %v207_v9  ;;  %v165_v16 = vmul.f32 -0.5, %v207_v9  ;;  %v168_v43 = vand.u32 2147483647, %v207_v9  ;;  %v102_v44 = vsel %vm100_vm1, 1.0, %v207_v9 }
  0x1e   :  { %208 = vrcp.f32 %v103_v10  ;;  %vm110_vm2 = vweird.f32 %v103_v10  ;;  %v116_v17 = vand.u32 2147483648, %v103_v10  ;;  %v114_v21 = vand.u32 2147483647, %v103_v10 }
  0x1f   :  { %210 = vrcp.f32 %v104_v11  ;;  %v131_v22 = vand.u32 2147483648, %v104_v11  ;;  %vm125_vm4 = vweird.f32 %v104_v11  ;;  %v129_v24 = vand.u32 2147483647, %v104_v11 }
  0x20   :  { %212 = vlog2.f32 %v103_v10  ;;  %v117_v31 = vor.u32 1.1754944e-38, %v116_v17  ;;  %v157_v34 = vadd.f32 1.0, %v156_v15  ;;  %vm115_vm7 = vcmp.eq.f32.partialorder %v114_v21, 8.507059e+37 }
  0x21   :  { %214 = vlog2.f32 %v104_v11  ;;  %v132_v38 = vor.u32 1.1754944e-38, %v131_v22  ;;  %v166_v39 = vadd.f32 1.0, %v165_v16  ;;  %vm130_vm9 = vcmp.eq.f32.partialorder %v129_v24, 8.507059e+37 }
  0x22   :  { %vm382_vm10 = vcmp.lt.f32.partialorder %v159_v28, 0.0004427343  ;;  %v158_v52 = vmul.f32 %v205_v8, %v157_v34  ;;  %vm388_vm11 = vcmp.lt.f32.partialorder %v168_v43, 0.0004427343 }
  0x23   :  { %v167_v57 = vmul.f32 %v207_v9, %v166_v39 }
  0x24   :  { %v209_v12 = vpop.eup %208 }
  0x25   :  { %v211_v13 = vpop.eup %210  ;;  %v106_v14 = vmul.f32 %v209_v12, %v103_v10  ;;  %vm111_vm3 = vweird.f32 %v209_v12 }
  0x26   :  { %v121_v18 = vmul.f32 %v211_v13, %v104_v11  ;;  %vm126_vm5 = vweird.f32 %v211_v13  ;;  %vm364_vm6 = vmor %vm110_vm2, %vm111_vm3  ;;  %v213_v35 = vpop.eup %212 }
  0x27   :  { %v107_v20 = vsub.f32 1.0, %v106_v14  ;;  %vm371_vm8 = vmor %vm125_vm4, %vm126_vm5  ;;  %v215_v40 = vpop.eup %214  ;;  %v155_v51 = vmul.f32 0.6931472, %v213_v35 }
  0x28   :  { %v122_v23 = vsub.f32 1.0, %v121_v18  ;;  %v164_v56 = vmul.f32 0.6931472, %v215_v40 }
  0x29   :  { %v108_v25 = vmul.f32 %v209_v12, %v107_v20  ;;  %v161_v2 = vsel %vm382_vm10, %v158_v52, %v155_v51 }
  0x2a   :  { %v123_v32 = vmul.f32 %v211_v13, %v122_v23  ;;  %v170_v5 = vsel %vm388_vm11, %v167_v57, %v164_v56  ;;  %v171_v9 = vadd.f32 %v161_v2, %v151_v62 }
  0x2b   :  { %v109_v36 = vadd.f32 %v209_v12, %v108_v25  ;;  %v172_v11 = vadd.f32 %v170_v5, %v152_v1 }
  0x2c   :  { %v124_v42 = vadd.f32 %v211_v13, %v123_v32 }
  0x2d   :  { %v113_v45 = vsel %vm364_vm6, %v209_v12, %v109_v36 }
  0x2e   :  { %v118_v49 = vsel %vm115_vm7, %v117_v31, %v113_v45  ;;  %v128_v50 = vsel %vm371_vm8, %v211_v13, %v124_v42 }
  0x2f   :  { %v119_v54 = vmul.f32 %v118_v49, %v101_v41  ;;  %v133_v55 = vsel %vm130_vm9, %v132_v38, %v128_v50 }
  0x30   :  { %v134_v58 = vmul.f32 %v133_v55, %v102_v44 }
  0x31   :  { %v135_v60 = vmul.f32 %v119_v54, %v119_v54 }
  0x32   :  { %v136_v63 = vmul.f32 %v134_v58, %v134_v58 }
  0x33   :  { %v137_v3 = vmul.f32 0.75, %v135_v60 }
  0x34   :  { %v138_v6 = vmul.f32 0.75, %v136_v63 }
  0x35   :  { %v141_v8 = vmul.f32 %v139_v61, %v137_v3 }
  0x36   :  { %v142_v10 = vmul.f32 %v140_v0, %v138_v6 }
  0x37   :  { %v145_v12 = vadd.f32 %v143_v4, %v141_v8 }
  0x38   :  { %v146_v13 = vadd.f32 %v144_v7, %v142_v10 }
  0x39   :  { %v173_v14 = vmul.f32 %v171_v9, %v145_v12 }
  0x3a   :  { %v174_v15 = vmul.f32 %v172_v11, %v146_v13 }
  0x3c   :  { %v176_v16 = vadd.f32 %v174_v15, %v173_v14 }
  0x3e   :  { %178 = vst [vmem:[#allocation8] sm:$0xff] %v176_v16 }
  0x3f   :  { %189 = dma.vmem_to_hbm [thread:$0]  %s185_s2, 128, %s187_s30, [#allocation4]  }
  0x40   :  { %316 = dma.done.wait [#allocation4], 128  }
  0x41   :  { %317 = vsyncadd [#allocation4], 4294967168 }
  0x42   :  { %194 = vsyncpa [#allocation3], 1 }
  0x43   :  { %195 = vsyncpa [#allocation6], 1 }
  0x44   :  { %196 = vsyncpa [#allocation4], 1 }

</bundles_post_ra>
